<compile_context>
chip_gen: v6e
topology: v6e:2x2x1
jax: 0.10.0
libtpu: 0.0.40
codegen_flags: <defaults>
</compile_context>

<pallas_src>
import functools

import jax
import jax.numpy as jnp
import numpy as np
from jax.experimental import pallas as pl
from jax.experimental.pallas import tpu as pltpu


# ---------------------------------------------------------------------------
# Kernels (pure elementwise; math in f32, cast on store)
# ---------------------------------------------------------------------------
def _iterator_kernel_det(x_ref, y_ref, out_ref, *, a, b):
    x = x_ref[...].astype(jnp.float32)
    y = y_ref[...].astype(jnp.float32)
    out_ref[...] = (a * x + b * y).astype(out_ref.dtype)


def _iterator_kernel_sto(x_ref, y_ref, n_ref, out_ref, *, a, b, noise_std):
    x = x_ref[...].astype(jnp.float32)
    y = y_ref[...].astype(jnp.float32)
    n = n_ref[...]
    out_ref[...] = (a * x + b * y + noise_std * n).astype(out_ref.dtype)


# ---------------------------------------------------------------------------
# Tiling helper: ~target_bytes per input stream per block, rows multiple of 8
# (sublane), lane dim spans the full flattened spatial axis. Sized for the
# smallest VMEM target (v7x, 64 MiB physical / 32 MiB scoped): 2 MiB blocks x
# (3-4 streams) x 2 pipeline stages stays far under budget.
# ---------------------------------------------------------------------------
def _pick_tile_rows(rows, cols, itemsize, target_bytes=2 << 20):
    if rows <= 8 or rows * cols * itemsize <= target_bytes:
        return int(rows)  # single / full block (block dim == full dim is legal)
    t = (target_bytes // (cols * itemsize)) // 8 * 8
    return int(max(8, min(t, (rows // 8) * 8)))


# ---------------------------------------------------------------------------
# Wrapper
# ---------------------------------------------------------------------------
def iterator_forward(x, y, *, gamma, sigma, alpha=1.0, deterministic=False,
                     key=None, tile_rows=None, donate_state=False):
    """Pallas implementation of Iterator.forward.

    x, y: arrays of shape (B, C, H, W) (NCHW, matching PyTorch).
    key:  jax PRNGKey for the stochastic path (thread a fresh one per step).
    donate_state: alias the output HBM buffer onto x (use inside a jitted
                  sampler step with donated state).
    """
    assert x.shape == y.shape, "x and y must have the same shape"
    B, C, H, W = x.shape
    rows, cols = B * C, H * W

    x2 = x.reshape(rows, cols)
    y2 = y.reshape(rows, cols)

    # Folded constants:  out = a*x + b*y (+ noise_std * n)
    a = float(1.0 - gamma * (1.0 + alpha / (sigma * sigma)))
    b = float(gamma)
    noise_std = float(np.sqrt(2.0 * gamma))

    itemsize = np.dtype(x.dtype).itemsize
    tr = int(tile_rows) if tile_rows is not None else _pick_tile_rows(
        rows, cols, itemsize)
    grid = (pl.cdiv(rows, tr),)
    spec = pl.BlockSpec((tr, cols), lambda i: (i, 0))

    if deterministic:
        kernel = functools.partial(_iterator_kernel_det, a=a, b=b)
        inputs = (x2, y2)
        in_specs = [spec, spec]
    else:
        if key is None:
            key = jax.random.PRNGKey(0)
        noise2 = jax.random.normal(key, (rows, cols), dtype=jnp.float32)
        kernel = functools.partial(_iterator_kernel_sto, a=a, b=b,
                                   noise_std=noise_std)
        inputs = (x2, y2, noise2)
        in_specs = [spec, spec, spec]

    out2 = pl.pallas_call(
        kernel,
        out_shape=jax.ShapeDtypeStruct((rows, cols), x.dtype),
        grid=grid,
        in_specs=in_specs,
        out_specs=spec,
        compiler_params=pltpu.CompilerParams(
            dimension_semantics=("parallel",)),
        input_output_aliases=({0: 0} if donate_state else {}),
    )(*inputs)

    return out2.reshape(B, C, H, W)


# ---------------------------------------------------------------------------
# Pure-JAX reference (same stand-in likelihood/prior)
# ---------------------------------------------------------------------------
def _reference_deterministic(x, y, *, gamma, sigma, alpha):
    lhood = x - y
    lprior = (alpha / (sigma * sigma)) * x
    return x - gamma * (lhood + lprior)


if __name__ == "__main__":
    key = jax.random.PRNGKey(0)
    kx, ky = jax.random.split(key)

    gamma, sigma, alpha = 0.05, 0.5, 1.0

    # --- Small NCHW shape consistent with the module ------------------------
    B, C, H, W = 2, 4, 16, 16
    x = jax.random.normal(kx, (B, C, H, W), dtype=jnp.float32)
    y = jax.random.normal(ky, (B, C, H, W), dtype=jnp.float32)
    ref = _reference_deterministic(x, y, gamma=gamma, sigma=sigma, alpha=alpha)

    # Deterministic path: exact semantics vs pure-JAX reference.
    out_det = iterator_forward(x, y, gamma=gamma, sigma=sigma, alpha=alpha,
                               deterministic=True)
    jax.block_until_ready(out_det)
    np.testing.assert_allclose(np.asarray(out_det), np.asarray(ref),
                               rtol=1e-5, atol=1e-5)

    # Stochastic (default) path: fused noise add; verify against reference
    # since the noise is a deterministic function of the provided key.
    kstep = jax.random.PRNGKey(1234)
    out_sto = iterator_forward(x, y, gamma=gamma, sigma=sigma, alpha=alpha,
                               deterministic=False, key=kstep)
    jax.block_until_ready(out_sto)
    noise = jax.random.normal(kstep, (B * C, H * W),
                              dtype=jnp.float32).reshape(B, C, H, W)
    ref_sto = ref + np.sqrt(2.0 * gamma) * noise
    np.testing.assert_allclose(np.asarray(out_sto), np.asarray(ref_sto),
                               rtol=1e-5, atol=1e-5)
    assert out_sto.shape == x.shape and out_sto.dtype == x.dtype

    # --- Larger shape forcing a multi-step (pipelined) row grid -------------
    B2, C2, H2, W2 = 4, 8, 16, 16          # rows = 32, tile_rows=8 -> grid=(4,)
    x_big = jax.random.normal(kx, (B2, C2, H2, W2), dtype=jnp.float32)
    y_big = jax.random.normal(ky, (B2, C2, H2, W2), dtype=jnp.float32)
    out_big = iterator_forward(x_big, y_big, gamma=gamma, sigma=sigma,
                               alpha=alpha, deterministic=True, tile_rows=8)
    jax.block_until_ready(out_big)
    ref_big = _reference_deterministic(x_big, y_big, gamma=gamma, sigma=sigma,
                                       alpha=alpha)
    np.testing.assert_allclose(np.asarray(out_big), np.asarray(ref_big),
                               rtol=1e-5, atol=1e-5)

    print("KERNEL_OK")
</pallas_src>

<mosaic_0001>
module attributes {stable_mosaic.version = 11 : i64} {
  func.func @_iterator_kernel_det(%arg0: i32, %arg1: memref<8x256xf32, #tpu.memory_space<vmem>>, %arg2: memref<8x256xf32, #tpu.memory_space<vmem>>, %arg3: memref<8x256xf32, #tpu.memory_space<vmem>>) attributes {dimension_semantics = [#tpu.dimension_semantics<parallel>], iteration_bounds = array<i64: 1>, scalar_prefetch = 0 : i64, scratch_operands = 0 : i64, tpu.core_type = #tpu.core_type<tc>, window_params = [{transform_indices = @transform_0, window_bounds = array<i64: 8, 256>}, {transform_indices = @transform_1, window_bounds = array<i64: 8, 256>}, {transform_indices = @transform_2, window_bounds = array<i64: 8, 256>}]} {
    %c0 = arith.constant 0 : index
    %c0_0 = arith.constant 0 : index
    %0 = vector.load %arg1[%c0, %c0_0] : memref<8x256xf32, #tpu.memory_space<vmem>>, vector<8x256xf32>
    %c0_1 = arith.constant 0 : index
    %c0_2 = arith.constant 0 : index
    %1 = vector.load %arg2[%c0_1, %c0_2] : memref<8x256xf32, #tpu.memory_space<vmem>>, vector<8x256xf32>
    %cst = arith.constant 7.500000e-01 : f32
    %2 = vector.broadcast %cst : f32 to vector<8x256xf32>
    %3 = arith.mulf %2, %0 : vector<8x256xf32>
    %cst_3 = arith.constant 5.000000e-02 : f32
    %4 = vector.broadcast %cst_3 : f32 to vector<8x256xf32>
    %5 = arith.mulf %4, %1 : vector<8x256xf32>
    %6 = arith.addf %3, %5 : vector<8x256xf32>
    %c0_4 = arith.constant 0 : index
    %c0_5 = arith.constant 0 : index
    %7 = vector.load %arg3[%c0_4, %c0_5] : memref<8x256xf32, #tpu.memory_space<vmem>>, vector<8x256xf32>
    tpu.vector_store %arg3[%c0_4, %c0_5], %6 {strides = array<i32>} : memref<8x256xf32, #tpu.memory_space<vmem>>, vector<8x256xf32>,
    return
  }
  func.func @transform_0(%arg0: i32) -> (i32, i32) {
    %c0_i32 = arith.constant 0 : i32
    %c0_i32_0 = arith.constant 0 : i32
    return %arg0, %c0_i32 : i32, i32
  }
  func.func @transform_1(%arg0: i32) -> (i32, i32) {
    %c0_i32 = arith.constant 0 : i32
    %c0_i32_0 = arith.constant 0 : i32
    return %arg0, %c0_i32 : i32, i32
  }
  func.func @transform_2(%arg0: i32) -> (i32, i32) {
    %c0_i32 = arith.constant 0 : i32
    %c0_i32_0 = arith.constant 0 : i32
    return %arg0, %c0_i32 : i32, i32
  }
}

</mosaic_0001>

<bundles_post_ra>
// kernel: tpu_custom_call.1
= control target key start
LH: loop header
LB: loop body
LE: loop exit
PB: predicated region body
PF: predicated region fallthrough
CT: control target
= control target key end

     0   :  { %7 = vsyncpa [#allocation3], 0  ;;  %s160_s0 = inlined_call_operand.hbm [shape: f32[8,256], index: 0, kind: input, shape index: {}]   ;;  %s161_s1 = inlined_call_operand.hbm [shape: f32[8,256], index: 1, kind: input, shape index: {}]   ;;  %s162_s2 = inlined_call_operand.hbm [shape: f32[8,256], index: 2, kind: output, shape index: {}]  }
   0x1   :  { %8 = vsyncpa [#allocation6], 0 }
   0x2   :  { %9 = vsyncpa [#allocation4], 0  ;;  %s133_s9 = smov [#allocation2]   ;;  %s134_s11 = smov [#allocation5]  }
   0x3   :  { %s16_s10 = sshll.u32 %s133_s9, 4  ;;  %s26_s12 = sshll.u32 %s134_s11, 4  ;;  %s17_s10 = int_to_ptr.vmem [resolvable:$true] %s16_s10  ;;  %s27_s12 = int_to_ptr.vmem [resolvable:$true] %s26_s12 }
   0x4   :  { %s75_s13 = scalar_lea.vmem %s17_s10, 256  ;;  %p80_p1 = scmp.lt.s32.totalorder %s17_s10, %s17_s10 }
   0x5   :  { %p76_p0 = scmp.ne.s32.totalorder %s17_s10, %s75_s13  ;;  %p81_p2 = scmp.lt.s32.totalorder %s75_s13, %s75_s13 }
   0x7   :  { %p82_p3 = por %p81_p2, %p80_p1 }
   0x9   :  { %p83_p4 = pnand %p82_p3, %p76_p0 }
   0xb   :  { %86 = shalt.err (!%p83_p4)
}
   0xc   :  { %19 = dma.hbm_to_vmem [thread:$0]  %s160_s0, 256, %s17_s10, [#allocation3]  }
   0xd   :  { %s95_s16 = scalar_lea.vmem %s27_s12, 256  ;;  %p100_p6 = scmp.lt.s32.totalorder %s27_s12, %s27_s12 }
   0xe   :  { %p96_p5 = scmp.ne.s32.totalorder %s27_s12, %s95_s16  ;;  %p101_p7 = scmp.lt.s32.totalorder %s95_s16, %s95_s16 }
  0x10   :  { %p102_p8 = por %p101_p7, %p100_p6 }
  0x12   :  { %p103_p9 = pnand %p102_p8, %p96_p5 }
  0x14   :  { %106 = shalt.err (!%p103_p9)
}
  0x15   :  { %29 = dma.hbm_to_vmem [thread:$0]  %s161_s1, 256, %s27_s12, [#allocation6]  }
  0x16   :  { %127 = dma.done.wait [#allocation3], 256  }
  0x17   :  { %128 = vsyncadd [#allocation3], 4294967040 }
  0x18   :  { %129 = dma.done.wait [#allocation6], 256  }
  0x19   :  { %130 = vsyncadd [#allocation6], 4294967040  ;;  %v36_v0 = vld [vmem:[#allocation2] sm:$0xff]  ;;  %v38_v1 = vld [vmem:[#allocation5] sm:$0xff]  ;;  %s135_s0 = smov [#allocation7]  }
  0x1a   :  { %v37_v2 = vld [vmem:[#allocation2 + $0x8] sm:$0xff]  ;;  %v40_v3 = vmul.f32 0.75, %v36_v0  ;;  %v42_v4 = vmul.f32 0.05, %v38_v1  ;;  %v39_v5 = vld [vmem:[#allocation5 + $0x8] sm:$0xff]  ;;  %s54_s19 = sshll.u32 %s135_s0, 4  ;;  %s55_s19 = int_to_ptr.vmem [resolvable:$true] %s54_s19 }
  0x1b   :  { %v41_v6 = vmul.f32 0.75, %v37_v2  ;;  %v43_v7 = vmul.f32 0.05, %v39_v5  ;;  %s107_s1 = scalar_lea.vmem %s55_s19, 256  ;;  %p112_p11 = scmp.lt.s32.totalorder %s55_s19, %s55_s19 }
  0x1c   :  { %v44_v8 = vadd.f32 %v42_v4, %v40_v3  ;;  %p108_p10 = scmp.ne.s32.totalorder %s55_s19, %s107_s1  ;;  %p113_p12 = scmp.lt.s32.totalorder %s107_s1, %s107_s1 }
  0x1d   :  { %v45_v9 = vadd.f32 %v43_v7, %v41_v6 }
  0x1e   :  { %46 = vst [vmem:[#allocation7] sm:$0xff] %v44_v8  ;;  %p114_p13 = por %p113_p12, %p112_p11 }
  0x1f   :  { %47 = vst [vmem:[#allocation7 + $0x8] sm:$0xff] %v45_v9 }
  0x20   :  { %p115_p0 = pnand %p114_p13, %p108_p10 }
  0x22   :  { %118 = shalt.err (!%p115_p0)
}
  0x23   :  { %57 = dma.vmem_to_hbm [thread:$0]  %s55_s19, 256, %s162_s2, [#allocation4]  }
  0x24   :  { %131 = dma.done.wait [#allocation4], 256  }
  0x25   :  { %132 = vsyncadd [#allocation4], 4294967040 }
  0x26   :  { %61 = vsyncpa [#allocation3], 1 }
  0x27   :  { %62 = vsyncpa [#allocation6], 1 }
  0x28   :  { %63 = vsyncpa [#allocation4], 1 }

</bundles_post_ra>
